<compile_context>
chip_gen: v7x
topology: tpu7x:2x2x1
jax: 0.10.0
libtpu: 0.0.40
codegen_flags: <defaults>
</compile_context>

<pallas_src>
import functools
import math

import jax
import jax.numpy as jnp
import numpy as np
from jax.experimental import pallas as pl
from jax.experimental.pallas import tpu as pltpu

# Scoped-VMEM limit: above the 16/32 MiB defaults, below v7x's 64 MiB physical
# (leaves headroom); v5e/v6e have 128 MiB so this is always safe.
_VMEM_LIMIT_BYTES = 48 * 1024 * 1024

# Row-tile target for the phase-1 matmul.  1024 rows is sized for v7x's 64 MiB
# VMEM; on v5e/v6e (128 MiB) this can be swept ~2x larger.
_ROW_TILE_TARGET = 1024


def _round_up(v, m):
    return (v + m - 1) // m * m


def _clips_per_tile(batch, n_pad, target_rows):
    """Largest divisor of `batch` whose row-tile (clips*n_pad) fits the target."""
    best = 1
    for c in range(1, batch + 1):
        if batch % c == 0 and c * n_pad <= max(target_rows, n_pad):
            best = c
    return best


# ---------------------------------------------------------------------------
# Phase 1: assignment logits = x @ clusters   (row-tiled, MXU)
# ---------------------------------------------------------------------------
def _logits_kernel(x_ref, c_ref, out_ref, *, mxu_dtype):
    out_ref[...] = jnp.dot(
        x_ref[...].astype(mxu_dtype),
        c_ref[...].astype(mxu_dtype),
        preferred_element_type=jnp.float32,
    )


# ---------------------------------------------------------------------------
# Phase 2: per-clip BN affine + softmax + VLAD aggregation (lane-dense (K, D))
# ---------------------------------------------------------------------------
def _vlad_kernel(logits_ref, x_ref, scale_ref, shift_ref, c2_ref, out_ref, *,
                 n_real, n_pad, k_real, k_pad, mxu_dtype):
    eps_sq = 1e-24  # (1e-12)^2 -- clamp squared norms, matches max(norm, eps)

    # BatchNorm affine with precomputed global scale/shift: a = logits*s + t
    a = logits_ref[...] * scale_ref[...] + shift_ref[...]        # (N_pad, K_pad)

    # Mask ghost clusters (zero-padded K columns) so softmax ignores them.
    if k_real != k_pad:
        col = jax.lax.broadcasted_iota(jnp.int32, a.shape, 1)
        a = jnp.where(col < k_real, a, -1e30)

    # Softmax over the cluster axis; divide -> EUP approximate reciprocal.
    m = jnp.max(a, axis=1, keepdims=True)
    e = jnp.exp(a - m)
    p = e * pl.reciprocal(jnp.sum(e, axis=1, keepdims=True), approx=True)

    # Mask ghost frames (zero-padded N rows) out of the aggregation.
    if n_real != n_pad:
        row = jax.lax.broadcasted_iota(jnp.int32, p.shape, 0)
        p = jnp.where(row < n_real, p, 0.0)

    x_b = x_ref[...]                                             # (N_pad, D_pad)

    # vlad^T = assignment^T @ x  -> (K_pad, D_pad): D on the 128-lane axis.
    vlad = jax.lax.dot_general(
        p.astype(mxu_dtype), x_b.astype(mxu_dtype),
        dimension_numbers=(((0,), (0,)), ((), ())),
        preferred_element_type=jnp.float32)                      # (K_pad, D_pad)

    # a-term: a_sum (1, K) * clusters2 (D, K), transposed via the (idle) XLU.
    a_sum = jnp.sum(p, axis=0, keepdims=True)                    # (1, K_pad)
    a_dk = a_sum * c2_ref[...]                                   # (D_pad, K_pad)
    vlad = vlad - jnp.transpose(a_dk)                            # (K_pad, D_pad)

    # F.normalize over the feature dim D (now a full-width lane reduction).
    ssq = jnp.sum(vlad * vlad, axis=1, keepdims=True)            # (K_pad, 1)
    vlad = vlad * jax.lax.rsqrt(jnp.maximum(ssq, eps_sq))

    # F.normalize of the flattened clip vector == Frobenius scaling.
    gssq = jnp.sum(vlad * vlad)
    vlad = vlad * jax.lax.rsqrt(jnp.maximum(gssq, eps_sq))

    out_ref[0] = vlad                                            # unmasked, lane-dense


# ---------------------------------------------------------------------------
# Wrapper
# ---------------------------------------------------------------------------
def netvlad_forward(x, clusters, clusters2, gamma, beta, *, batch, num_frames,
                    mxu_dtype=jnp.float32):
    bn_rows, d = x.shape
    k = clusters.shape[1]
    assert bn_rows == batch * num_frames
    if clusters2.ndim == 3:                      # accept the torch (1, D, K) param
        clusters2 = clusters2[0]

    n_pad = _round_up(num_frames, 8)
    d_pad = _round_up(d, 128)
    k_pad = _round_up(k, 128)
    rows = batch * n_pad

    # --- pad inputs (zero ghost features / clusters / frames) ---------------
    x3 = x.reshape(batch, num_frames, d)
    x3 = jnp.pad(x3, ((0, 0), (0, n_pad - num_frames), (0, d_pad - d)))
    xp = x3.reshape(rows, d_pad).astype(mxu_dtype)       # bf16 halves HBM/VMEM traffic
    cp = jnp.pad(clusters, ((0, d_pad - d), (0, k_pad - k))).astype(mxu_dtype)
    c2p = jnp.pad(clusters2, ((0, d_pad - d), (0, k_pad - k))).astype(jnp.float32)
    gp = jnp.pad(jnp.reshape(gamma, (1, k)).astype(jnp.float32),
                 ((0, 0), (0, k_pad - k)), constant_values=1.0)
    bp = jnp.pad(jnp.reshape(beta, (1, k)).astype(jnp.float32),
                 ((0, 0), (0, k_pad - k)))

    # --- phase 1: row-tiled logits matmul ------------------------------------
    cpt = _clips_per_tile(batch, n_pad, _ROW_TILE_TARGET)
    row_tile = cpt * n_pad
    itemsize = jnp.dtype(mxu_dtype).itemsize
    logits = pl.pallas_call(
        functools.partial(_logits_kernel, mxu_dtype=mxu_dtype),
        out_shape=jax.ShapeDtypeStruct((rows, k_pad), jnp.float32),
        grid=(rows // row_tile,),
        in_specs=[
            pl.BlockSpec((row_tile, d_pad), lambda i: (i, 0)),
            pl.BlockSpec((d_pad, k_pad), lambda i: (0, 0)),
        ],
        out_specs=pl.BlockSpec((row_tile, k_pad), lambda i: (i, 0)),
        compiler_params=pltpu.CompilerParams(
            dimension_semantics=("parallel",),
            vmem_limit_bytes=_VMEM_LIMIT_BYTES),
        cost_estimate=pl.CostEstimate(
            flops=2 * rows * d_pad * k_pad,
            transcendentals=0,
            bytes_accessed=rows * d_pad * itemsize + d_pad * k_pad * itemsize
                           + rows * k_pad * 4),
    )(xp, cp)

    # --- glue: global BatchNorm (training-mode) statistics over real rows ----
    real = logits.reshape(batch, n_pad, k_pad)[:, :num_frames, :]
    real = real.reshape(batch * num_frames, k_pad)
    mean = jnp.mean(real, axis=0, keepdims=True)
    var = jnp.mean(jnp.square(real - mean), axis=0, keepdims=True)  # biased var
    inv_std = jax.lax.rsqrt(var + 1e-5)
    scale = gp * inv_std                       # (1, K_pad)
    shift = bp - mean * scale                  # (1, K_pad)

    # --- phase 2: per-clip aggregation, lane-dense (K, D) output -------------
    vlad_t = pl.pallas_call(
        functools.partial(_vlad_kernel, n_real=num_frames, n_pad=n_pad,
                          k_real=k, k_pad=k_pad, mxu_dtype=mxu_dtype),
        out_shape=jax.ShapeDtypeStruct((batch, k_pad, d_pad), jnp.float32),
        grid=(batch,),
        in_specs=[
            pl.BlockSpec((n_pad, k_pad), lambda b: (b, 0)),   # logits (per clip)
            pl.BlockSpec((n_pad, d_pad), lambda b: (b, 0)),   # x      (per clip)
            pl.BlockSpec((1, k_pad), lambda b: (0, 0)),       # BN scale
            pl.BlockSpec((1, k_pad), lambda b: (0, 0)),       # BN shift
            pl.BlockSpec((d_pad, k_pad), lambda b: (0, 0)),   # clusters2
        ],
        out_specs=pl.BlockSpec((1, k_pad, d_pad), lambda b: (b, 0, 0)),
        compiler_params=pltpu.CompilerParams(
            dimension_semantics=("parallel",),
            vmem_limit_bytes=_VMEM_LIMIT_BYTES),
        cost_estimate=pl.CostEstimate(
            flops=2 * batch * n_pad * k_pad * d_pad + 8 * batch * k_pad * d_pad,
            transcendentals=batch * n_pad * (k_pad + 1) + 3 * batch * k_pad,
            bytes_accessed=rows * (k_pad * 4 + d_pad * itemsize)
                           + d_pad * k_pad * 4 + 2 * k_pad * 4
                           + batch * k_pad * d_pad * 4),
    )(logits, xp, scale, shift, c2p)

    # --- glue: drop ghost clusters/features, flatten in torch's (D, K) order -
    out = vlad_t[:, :k, :d]                    # (B, K, D)
    out = jnp.swapaxes(out, 1, 2)              # (B, D, K)
    return out.reshape(batch, d * k)


# ---------------------------------------------------------------------------
# Pure-JAX reference mirroring the PyTorch forward
# ---------------------------------------------------------------------------
def netvlad_ref(x, clusters, clusters2, gamma, beta, batch, num_frames):
    assignment = x @ clusters
    mean = jnp.mean(assignment, axis=0, keepdims=True)
    var = jnp.mean((assignment - mean) ** 2, axis=0, keepdims=True)
    assignment = (assignment - mean) / jnp.sqrt(var + 1e-5) * gamma + beta
    assignment = jax.nn.softmax(assignment, axis=1)
    k = clusters.shape[1]
    assignment = assignment.reshape(batch, num_frames, k)
    a_sum = jnp.sum(assignment, axis=1, keepdims=True)
    a = a_sum * clusters2[None]                      # (B, D, K)
    assignment_t = jnp.swapaxes(assignment, 1, 2)    # (B, K, N)
    xr = x.reshape(batch, num_frames, -1)            # (B, N, D)
    vlad = jnp.matmul(assignment_t, xr)              # (B, K, D)
    vlad = jnp.swapaxes(vlad, 1, 2)                  # (B, D, K)
    vlad = vlad - a
    norm = jnp.sqrt(jnp.sum(vlad ** 2, axis=1, keepdims=True))
    vlad = vlad / jnp.maximum(norm, 1e-12)
    vlad = vlad.reshape(batch, -1)
    norm2 = jnp.sqrt(jnp.sum(vlad ** 2, axis=1, keepdims=True))
    vlad = vlad / jnp.maximum(norm2, 1e-12)
    return vlad


if __name__ == "__main__":
    # Small deterministic problem: B=2 clips, N=8 frames, D=32 features, K=16.
    B, N, D, K = 2, 8, 32, 16

    key = jax.random.PRNGKey(0)
    kx, kc, kc2, kx2 = jax.random.split(key, 4)

    x = jax.random.normal(kx, (B * N, D), dtype=jnp.float32)
    clusters = (1.0 / math.sqrt(D)) * jax.random.normal(kc, (D, K), jnp.float32)
    clusters2 = (1.0 / math.sqrt(D)) * jax.random.normal(kc2, (D, K), jnp.float32)
    gamma = jnp.ones((1, K), jnp.float32)   # BatchNorm1d default weight
    beta = jnp.zeros((1, K), jnp.float32)   # BatchNorm1d default bias

    # f32 MXU path (strict numerical check vs reference).
    fwd_f32 = jax.jit(functools.partial(netvlad_forward, batch=B, num_frames=N,
                                        mxu_dtype=jnp.float32))
    out = jax.block_until_ready(fwd_f32(x, clusters, clusters2, gamma, beta))
    assert out.shape == (B, D * K)
    ref = netvlad_ref(x, clusters, clusters2, gamma, beta, B, N)
    np.testing.assert_allclose(np.asarray(out), np.asarray(ref),
                               atol=5e-3, rtol=5e-3)

    # Frame count not a multiple of 8 -> exercises ghost-frame masking.
    N2 = 12
    x2 = jax.random.normal(kx2, (B * N2, D), dtype=jnp.float32)
    fwd_n2 = jax.jit(functools.partial(netvlad_forward, batch=B, num_frames=N2,
                                       mxu_dtype=jnp.float32))
    out2 = jax.block_until_ready(fwd_n2(x2, clusters, clusters2, gamma, beta))
    ref2 = netvlad_ref(x2, clusters, clusters2, gamma, beta, B, N2)
    np.testing.assert_allclose(np.asarray(out2), np.asarray(ref2),
                               atol=5e-3, rtol=5e-3)

    # bf16 MXU-input path (v6e/v7x production config), loose check.
    fwd_bf16 = jax.jit(functools.partial(netvlad_forward, batch=B, num_frames=N,
                                         mxu_dtype=jnp.bfloat16))
    out_bf16 = jax.block_until_ready(fwd_bf16(x, clusters, clusters2, gamma, beta))
    np.testing.assert_allclose(np.asarray(out_bf16), np.asarray(ref),
                               atol=5e-2, rtol=5e-2)

    print("KERNEL_OK")
</pallas_src>

<mosaic_0001>
module attributes {stable_mosaic.version = 11 : i64} {
  func.func @_logits_kernel(%arg0: i32, %arg1: memref<16x128xf32, #tpu.memory_space<vmem>>, %arg2: memref<128x128xf32, #tpu.memory_space<vmem>>, %arg3: memref<16x128xf32, #tpu.memory_space<vmem>>) attributes {dimension_semantics = [#tpu.dimension_semantics<parallel>], iteration_bounds = array<i64: 1>, scalar_prefetch = 0 : i64, scratch_operands = 0 : i64, tpu.core_type = #tpu.core_type<tc>, window_params = [{transform_indices = @transform_0, window_bounds = array<i64: 16, 128>}, {pipeline_mode = #tpu.pipeline_mode<synchronous>, transform_indices = @transform_1, window_bounds = array<i64: 128, 128>}, {transform_indices = @transform_2, window_bounds = array<i64: 16, 128>}]} {
    %c0 = arith.constant 0 : index
    %c0_0 = arith.constant 0 : index
    %0 = vector.load %arg1[%c0, %c0_0] : memref<16x128xf32, #tpu.memory_space<vmem>>, vector<16x128xf32>
    %c0_1 = arith.constant 0 : index
    %c0_2 = arith.constant 0 : index
    %1 = vector.load %arg2[%c0_1, %c0_2] : memref<128x128xf32, #tpu.memory_space<vmem>>, vector<128x128xf32>
    %cst = arith.constant dense<0.000000e+00> : vector<16x128xf32>
    %2 = tpu.matmul %0, %1, %cst {dimension_numbers = #tpu.dot_dimension_numbers<[1], [0], [0], [1], [0, 0, 1, 1], [], []>} : vector<16x128xf32>, vector<128x128xf32>, vector<16x128xf32> -> vector<16x128xf32>
    %c0_3 = arith.constant 0 : index
    %c0_4 = arith.constant 0 : index
    %3 = vector.load %arg3[%c0_3, %c0_4] : memref<16x128xf32, #tpu.memory_space<vmem>>, vector<16x128xf32>
    tpu.vector_store %arg3[%c0_3, %c0_4], %2 {strides = array<i32>} : memref<16x128xf32, #tpu.memory_space<vmem>>, vector<16x128xf32>,
    return
  }
  func.func @transform_0(%arg0: i32) -> (i32, i32) {
    %c0_i32 = arith.constant 0 : i32
    %c0_i32_0 = arith.constant 0 : i32
    return %arg0, %c0_i32 : i32, i32
  }
  func.func @transform_1(%arg0: i32) -> (i32, i32) {
    %c0_i32 = arith.constant 0 : i32
    %c0_i32_0 = arith.constant 0 : i32
    %c0_i32_1 = arith.constant 0 : i32
    return %c0_i32, %c0_i32_0 : i32, i32
  }
  func.func @transform_2(%arg0: i32) -> (i32, i32) {
    %c0_i32 = arith.constant 0 : i32
    %c0_i32_0 = arith.constant 0 : i32
    return %arg0, %c0_i32 : i32, i32
  }
}

module attributes {stable_mosaic.version = 11 : i64} {
  func.func @_vlad_kernel(%arg0: i32, %arg1: memref<8x128xf32, #tpu.memory_space<vmem>>, %arg2: memref<8x128xf32, #tpu.memory_space<vmem>>, %arg3: memref<1x128xf32, #tpu.memory_space<vmem>>, %arg4: memref<1x128xf32, #tpu.memory_space<vmem>>, %arg5: memref<128x128xf32, #tpu.memory_space<vmem>>, %arg6: memref<1x128x128xf32, #tpu.memory_space<vmem>>) attributes {dimension_semantics = [#tpu.dimension_semantics<parallel>], iteration_bounds = array<i64: 2>, scalar_prefetch = 0 : i64, scratch_operands = 0 : i64, tpu.core_type = #tpu.core_type<tc>, window_params = [{transform_indices = @transform_0, window_bounds = array<i64: 8, 128>}, {transform_indices = @transform_1, window_bounds = array<i64: 8, 128>}, {pipeline_mode = #tpu.pipeline_mode<synchronous>, transform_indices = @transform_2, window_bounds = array<i64: 1, 128>}, {pipeline_mode = #tpu.pipeline_mode<synchronous>, transform_indices = @transform_3, window_bounds = array<i64: 1, 128>}, {pipeline_mode = #tpu.pipeline_mode<synchronous>, transform_indices = @transform_4, window_bounds = array<i64: 128, 128>}, {transform_indices = @transform_5, window_bounds = array<i64: 1, 128, 128>}]} {
    %c0 = arith.constant 0 : index
    %c0_0 = arith.constant 0 : index
    %0 = vector.load %arg1[%c0, %c0_0] : memref<8x128xf32, #tpu.memory_space<vmem>>, vector<8x128xf32>
    %c0_1 = arith.constant 0 : index
    %c0_2 = arith.constant 0 : index
    %1 = vector.load %arg3[%c0_1, %c0_2] : memref<1x128xf32, #tpu.memory_space<vmem>>, vector<1x128xf32>
    %2 = vector.broadcast %1 : vector<1x128xf32> to vector<8x128xf32>
    %3 = arith.mulf %0, %2 : vector<8x128xf32>
    %c0_3 = arith.constant 0 : index
    %c0_4 = arith.constant 0 : index
    %4 = vector.load %arg4[%c0_3, %c0_4] : memref<1x128xf32, #tpu.memory_space<vmem>>, vector<1x128xf32>
    %5 = vector.broadcast %4 : vector<1x128xf32> to vector<8x128xf32>
    %6 = arith.addf %3, %5 : vector<8x128xf32>
    %7 = tpu.iota {dimensions = array<i32: 1>} : vector<8x128xi32>
    %c16_i32 = arith.constant 16 : i32
    %8 = vector.broadcast %c16_i32 : i32 to vector<8x128xi32>
    %9 = arith.cmpi slt, %7, %8 : vector<8x128xi32>
    %cst = arith.constant -1.000000e+30 : f32
    %10 = vector.broadcast %cst : f32 to vector<8x128xf32>
    %11 = arith.select %9, %6, %10 : vector<8x128xi1>, vector<8x128xf32>
    %cst_5 = arith.constant dense<0xFF800000> : vector<8xf32>
    %12 = vector.multi_reduction <maximumf>, %11, %cst_5 [1] : vector<8x128xf32> to vector<8xf32>
    %13 = vector.shape_cast %12 : vector<8xf32> to vector<8x1xf32>
    %14 = vector.broadcast %13 : vector<8x1xf32> to vector<8x128xf32>
    %15 = arith.subf %11, %14 : vector<8x128xf32>
    %16 = math.exp %15 : vector<8x128xf32>
    %cst_6 = arith.constant dense<0.000000e+00> : vector<8xf32>
    %17 = vector.multi_reduction <add>, %16, %cst_6 [1] : vector<8x128xf32> to vector<8xf32>
    %18 = vector.shape_cast %17 : vector<8xf32> to vector<8x1xf32>
    %19 = tpu.reciprocal %18 {approx = true} : vector<8x1xf32> -> vector<8x1xf32>
    %20 = vector.broadcast %19 : vector<8x1xf32> to vector<8x128xf32>
    %21 = arith.mulf %16, %20 : vector<8x128xf32>
    %c0_7 = arith.constant 0 : index
    %c0_8 = arith.constant 0 : index
    %22 = vector.load %arg2[%c0_7, %c0_8] : memref<8x128xf32, #tpu.memory_space<vmem>>, vector<8x128xf32>
    %cst_9 = arith.constant dense<0.000000e+00> : vector<128x128xf32>
    %23 = tpu.matmul %21, %22, %cst_9 {dimension_numbers = #tpu.dot_dimension_numbers<[0], [0], [1], [1], [0, 1, 1, 1], [], []>} : vector<8x128xf32>, vector<8x128xf32>, vector<128x128xf32> -> vector<128x128xf32>
    %cst_10 = arith.constant dense<0.000000e+00> : vector<128xf32>
    %24 = vector.multi_reduction <add>, %21, %cst_10 [0] : vector<8x128xf32> to vector<128xf32>
    %25 = vector.shape_cast %24 : vector<128xf32> to vector<1x128xf32>
    %c0_11 = arith.constant 0 : index
    %c0_12 = arith.constant 0 : index
    %26 = vector.load %arg5[%c0_11, %c0_12] : memref<128x128xf32, #tpu.memory_space<vmem>>, vector<128x128xf32>
    %27 = vector.broadcast %25 : vector<1x128xf32> to vector<128x128xf32>
    %28 = arith.mulf %27, %26 : vector<128x128xf32>
    %29 = tpu.transpose %28, [1, 0] : vector<128x128xf32> -> vector<128x128xf32>
    %30 = arith.subf %23, %29 : vector<128x128xf32>
    %31 = arith.mulf %30, %30 : vector<128x128xf32>
    %cst_13 = arith.constant dense<0.000000e+00> : vector<128xf32>
    %32 = vector.multi_reduction <add>, %31, %cst_13 [1] : vector<128x128xf32> to vector<128xf32>
    %33 = vector.shape_cast %32 : vector<128xf32> to vector<128x1xf32>
    %cst_14 = arith.constant 1.000000e-24 : f32
    %34 = vector.broadcast %cst_14 : f32 to vector<128x1xf32>
    %35 = arith.maximumf %33, %34 : vector<128x1xf32>
    %36 = math.rsqrt %35 : vector<128x1xf32>
    %37 = vector.broadcast %36 : vector<128x1xf32> to vector<128x128xf32>
    %38 = arith.mulf %30, %37 : vector<128x128xf32>
    %39 = arith.mulf %38, %38 : vector<128x128xf32>
    %40 = vector.shape_cast %39 : vector<128x128xf32> to vector<1x128x128xf32>
    %cst_15 = arith.constant dense<0.000000e+00> : vector<1xf32>
    %41 = vector.multi_reduction <add>, %40, %cst_15 [1, 2] : vector<1x128x128xf32> to vector<1xf32>
    %42 = vector.shape_cast %41 : vector<1xf32> to vector<1x1x1xf32>
    %43 = vector.extract %42[0, 0, 0] : f32 from vector<1x1x1xf32>
    %cst_16 = arith.constant 1.000000e-24 : f32
    %44 = arith.maximumf %43, %cst_16 : f32
    %45 = math.rsqrt %44 : f32
    %46 = vector.broadcast %45 : f32 to vector<128x128xf32>
    %47 = arith.mulf %38, %46 : vector<128x128xf32>
    %c0_17 = arith.constant 0 : index
    %c0_18 = arith.constant 0 : index
    %c0_19 = arith.constant 0 : index
    %48 = vector.load %arg6[%c0_17, %c0_18, %c0_19] : memref<1x128x128xf32, #tpu.memory_space<vmem>>, vector<1x128x128xf32>
    %49 = vector.shape_cast %48 : vector<1x128x128xf32> to vector<128x128xf32>
    %50 = vector.shape_cast %47 : vector<128x128xf32> to vector<1x128x128xf32>
    tpu.vector_store %arg6[%c0_17, %c0_18, %c0_19], %50 {strides = array<i32>} : memref<1x128x128xf32, #tpu.memory_space<vmem>>, vector<1x128x128xf32>,
    return
  }
  func.func @transform_0(%arg0: i32) -> (i32, i32) {
    %c0_i32 = arith.constant 0 : i32
    %c0_i32_0 = arith.constant 0 : i32
    return %arg0, %c0_i32 : i32, i32
  }
  func.func @transform_1(%arg0: i32) -> (i32, i32) {
    %c0_i32 = arith.constant 0 : i32
    %c0_i32_0 = arith.constant 0 : i32
    return %arg0, %c0_i32 : i32, i32
  }
  func.func @transform_2(%arg0: i32) -> (i32, i32) {
    %c0_i32 = arith.constant 0 : i32
    %c0_i32_0 = arith.constant 0 : i32
    %c0_i32_1 = arith.constant 0 : i32
    return %c0_i32, %c0_i32_0 : i32, i32
  }
  func.func @transform_3(%arg0: i32) -> (i32, i32) {
    %c0_i32 = arith.constant 0 : i32
    %c0_i32_0 = arith.constant 0 : i32
    %c0_i32_1 = arith.constant 0 : i32
    return %c0_i32, %c0_i32_0 : i32, i32
  }
  func.func @transform_4(%arg0: i32) -> (i32, i32) {
    %c0_i32 = arith.constant 0 : i32
    %c0_i32_0 = arith.constant 0 : i32
    %c0_i32_1 = arith.constant 0 : i32
    return %c0_i32, %c0_i32_0 : i32, i32
  }
  func.func @transform_5(%arg0: i32) -> (i32, i32, i32) {
    %c0_i32 = arith.constant 0 : i32
    %c0_i32_0 = arith.constant 0 : i32
    %c0_i32_1 = arith.constant 0 : i32
    return %arg0, %c0_i32, %c0_i32_0 : i32, i32, i32
  }
}

</mosaic_0001>

<bundles_post_ra>
// kernel: netvlad_forward.2
= control target key start
LH: loop header
LB: loop body
LE: loop exit
PB: predicated region body
PF: predicated region fallthrough
CT: control target
= control target key end

     0   :  { %s270_s1 = inlined_call_operand.vmem [shape: f32[128,128], index: 1, kind: input, shape index: {}]   ;;  %s271_s0 = inlined_call_operand.vmem [shape: f32[16,128], index: 0, kind: input, shape index: {}]   ;;  %s272_s2 = inlined_call_operand.vmem [shape: f32[16,128], index: 2, kind: output, shape index: {}]  }
   0x1   :  { %v13_v0 = vld [vmem:[%s270_s1] sm:$0xff]  ;;  %v14_v1 = vld [vmem:[%s270_s1 + $0x8] sm:$0xff]  ;;  %v15_v2 = vld [vmem:[%s270_s1 + $0x10] sm:$0xff] }
   0x2   :  { %v163_v3 = vpack.c.bf16 %v14_v1, %v13_v0  ;;  %v16_v4 = vld [vmem:[%s270_s1 + $0x18] sm:$0xff]  ;;  %v17_v6 = vld [vmem:[%s270_s1 + $0x20] sm:$0xff]  ;;  %v18_v7 = vld [vmem:[%s270_s1 + $0x28] sm:$0xff] }
   0x3   :  { %v167_v5 = vpack.c.bf16 %v16_v4, %v15_v2  ;;  %v171_v8 = vpack.c.bf16 %v18_v7, %v17_v6  ;;  %v11_v9 = vld [vmem:[%s271_s0] sm:$0xff]  ;;  %v19_v10 = vld [vmem:[%s270_s1 + $0x30] sm:$0xff]  ;;  %v20_v11 = vld [vmem:[%s270_s1 + $0x38] sm:$0xff] }
   0x4   :  { %164 = vmatprep.subr.bf16.mxu0 %v163_v3  ;;  %160 = vmatprep.mubr.f32.mxu0 %v11_v9  ;;  %v175_v12 = vpack.c.bf16 %v20_v11, %v19_v10  ;;  %v21_v13 = vld [vmem:[%s270_s1 + $0x40] sm:$0xff]  ;;  %v22_v14 = vld [vmem:[%s270_s1 + $0x48] sm:$0xff]  ;;  %v23_v16 = vld [vmem:[%s270_s1 + $0x50] sm:$0xff] }
   0x5   :  { %166 = vmatpush3.bf16.msra.mxu0 %v163_v3  ;;  %v179_v15 = vpack.c.bf16 %v22_v14, %v21_v13  ;;  %v24_v17 = vld [vmem:[%s270_s1 + $0x58] sm:$0xff]  ;;  %v25_v19 = vld [vmem:[%s270_s1 + $0x60] sm:$0xff]  ;;  %v26_v20 = vld [vmem:[%s270_s1 + $0x68] sm:$0xff] }
   0x6   :  { %168 = vmatprep.subr.bf16.mxu0 %v167_v5  ;;  %v183_v18 = vpack.c.bf16 %v24_v17, %v23_v16  ;;  %v187_v21 = vpack.c.bf16 %v26_v20, %v25_v19  ;;  %v27_v22 = vld [vmem:[%s270_s1 + $0x70] sm:$0xff]  ;;  %v28_v23 = vld [vmem:[%s270_s1 + $0x78] sm:$0xff]  ;;  %v12_v25 = vld [vmem:[%s271_s0 + $0x8] sm:$0xff] }
   0x7   :  { %v191_v24 = vpack.c.bf16 %v28_v23, %v27_v22 }
   0x9   :  { %170 = vmatpush3.bf16.msra.mxu0 %v167_v5 }
   0xa   :  { %172 = vmatprep.subr.bf16.mxu0 %v171_v8 }
   0xd   :  { %174 = vmatpush3.bf16.msra.mxu0 %v171_v8 }
   0xe   :  { %176 = vmatprep.subr.bf16.mxu0 %v175_v12 }
  0x11   :  { %178 = vmatpush3.bf16.msra.mxu0 %v175_v12 }
  0x12   :  { %180 = vmatprep.subr.bf16.mxu0 %v179_v15 }
  0x15   :  { %182 = vmatpush3.bf16.msra.mxu0 %v179_v15 }
  0x16   :  { %184 = vmatprep.subr.bf16.mxu0 %v183_v18 }
  0x19   :  { %186 = vmatpush3.bf16.msra.mxu0 %v183_v18 }
  0x1a   :  { %188 = vmatprep.subr.bf16.mxu0 %v187_v21 }
  0x1d   :  { %190 = vmatpush3.bf16.msra.mxu0 %v187_v21 }
  0x1e   :  { %192 = vmatprep.subr.bf16.mxu0 %v191_v24 }
  0x21   :  { %194 = vmatpush3.bf16.msra.mxu0 %v191_v24 }
  0x24   :  { %161 = vmatmul.mubr.f32.vlgmr.msra.gmra.mrb[0].mxu0 %v12_v25 }
  0xf7   :  { %v162_v26 = vpop.f32.mrb[0].mxu0 }
  0xf8   :  { %105 = vst [vmem:[%s272_s2 + $0x8] sm:$0xff] %v162_v26  ;;  %v95_v27 = vpop.f32.mrb[1].mxu0 }
  0xf9   :  { %104 = vst [vmem:[%s272_s2] sm:$0xff] %v95_v27 }

// kernel: netvlad_forward.3
= control target key start
LH: loop header
LB: loop body
LE: loop exit
PB: predicated region body
PF: predicated region fallthrough
CT: control target
= control target key end

     0   :  { %s988_s18 = smov 0   ;;  %s1230_s0 = inlined_call_operand.vmem [shape: f32[16,128], index: 0, kind: input, shape index: {}]   ;;  %s1231_s1 = inlined_call_operand.vmem [shape: f32[16,128], index: 1, kind: input, shape index: {}]   ;;  %s1232_s2 = inlined_call_operand.vmem [shape: f32[1,128], index: 2, kind: input, shape index: {}]   ;;  %s1233_s3 = inlined_call_operand.vmem [shape: f32[1,128], index: 3, kind: input, shape index: {}]   ;;  %s1234_s4 = inlined_call_operand.vmem [shape: f32[128,128], index: 4, kind: input, shape index: {}]   ;;  %s1235_s5 = inlined_call_operand.vmem [shape: f32[2,128,128], index: 5, kind: output, shape index: {}]  }
   0x1 LB: > { %s822_s19 = sadd.s32 4294967295, %s955_s18   ;;  %p826_p0 = scmp.ge.s32.totalorder %s955_s18, 1  ;;  %s955_s18 = sphi %s988_s18, %s15_s18  }
   0x2   : > { %p195_p1 = scmp.lt.s32.totalorder %s955_s18, 3 }
   0x4   : > { %p196_p2 = pnand %p826_p0, %p195_p1 }
   0x5   : > { %p226_p3 = scmp.lt.s32.totalorder (!%p196_p2), %s822_s19, 1  ;;  %v256_v0 = vlaneseq (!%p196_p2)  ;;  %v831_v1 = vld [vmem:[%s1232_s2] ss:$0 sm:$0xff] (!%p196_p2)  ;;  %v503_v24 = vld [vmem:[%s1234_s4 + $0x8] sm:$0xff] (!%p196_p2)  ;;  %v504_v26 = vld [vmem:[%s1234_s4 + $0x10] sm:$0xff] (!%p196_p2)  ;;  %vm302_vm1 = vcmask (!%p196_p2), 64512  }
   0x6   : > { %199 = sbr.rel (%p196_p2) target bundleno = 1184 (0x4a0), region = 40  ;;  %v832_v4 = vld [vmem:[%s1233_s3] ss:$0 sm:$0xff] (!%p196_p2)  ;;  %v505_v28 = vld [vmem:[%s1234_s4 + $0x18] sm:$0xff] (!%p196_p2)  ;;  %v507_v32 = vld [vmem:[%s1234_s4 + $0x28] sm:$0xff] (!%p196_p2) }
   0x7   : > { %v257_v2 = vand.u32 (!%p196_p2), 127, %v256_v0  ;;  %v502_v22 = vld [vmem:[%s1234_s4] sm:$0xff] (!%p196_p2)  ;;  %v508_v34 = vld [vmem:[%s1234_s4 + $0x30] sm:$0xff] (!%p196_p2)  ;;  %v509_v36 = vld [vmem:[%s1234_s4 + $0x38] sm:$0xff] (!%p196_p2)  ;;  %s957_s16 = smov (!%p196_p2), 1e-24  }
   0x8   : > { %v506_v30 = vld [vmem:[%s1234_s4 + $0x20] sm:$0xff] (!%p196_p2)  ;;  %v511_v40 = vld [vmem:[%s1234_s4 + $0x48] sm:$0xff] (!%p196_p2)  ;;  %v512_v42 = vld [vmem:[%s1234_s4 + $0x50] sm:$0xff] (!%p196_p2) }
   0x9   : > { %vm258_vm0 = vcmp.lt.s32.totalorder (!%p196_p2), %v257_v2, 16  ;;  %v510_v38 = vld [vmem:[%s1234_s4 + $0x40] sm:$0xff] (!%p196_p2)  ;;  %v513_v44 = vld [vmem:[%s1234_s4 + $0x58] sm:$0xff] (!%p196_p2)  ;;  %v515_v48 = vld [vmem:[%s1234_s4 + $0x68] sm:$0xff] (!%p196_p2) }
   0xa   : > { %v514_v46 = vld [vmem:[%s1234_s4 + $0x60] sm:$0xff] (!%p196_p2)  ;;  %v516_v50 = vld [vmem:[%s1234_s4 + $0x70] sm:$0xff] (!%p196_p2)  ;;  %v517_v52 = vld [vmem:[%s1234_s4 + $0x78] sm:$0xff] (!%p196_p2) }
   0xd   : > { %s1237_s19 = smov (!%p226_p3, %s822_s19), 1 }
   0xe   : > { %s827_s20 = sshll.u32 %s1237_s19, 3 }
   0xf   : > { %s229_s25 = scalar_lea.vmem %s1230_s0, %s827_s20  ;;  %s233_s30 = scalar_lea.vmem %s1231_s1, %s827_s20 }
  0x10   : > { %v239_v3 = vld [vmem:[%s229_s25] sm:$0xff]  ;;  %s851_s20 = sshll.u32 %s1237_s19, 7 }
  0x11   : > { %v247_v5 = vmul.f32 %v831_v1, %v239_v3  ;;  %v269_v15 = vld [vmem:[%s233_s30] sm:$0xff]  ;;  %s1199_s24 = scalar_lea.vmem %s1235_s5, %s851_s20 }
  0x12   : > { %869 = vmatprep.subr.mxu0 %v269_v15  ;;  %895 = vmatprep.subr.mxu1 %v269_v15 }
  0x13   : > { %v255_v6 = vadd.f32 %v832_v4, %v247_v5  ;;  %870 = vmatpush3.msra.mxu0 %v269_v15  ;;  %896 = vmatpush3.msra.mxu1 %v269_v15 }
  0x15   : > { %v259_v7 = vsel %vm258_vm0, %v255_v6, -1e+30 }
  0x16   : > { %260 = vmax.xlane.f32.xlu0 %v259_v7 }
  0xa3   : > { %v261_v8 = vpop.xlane.xlu0 %260 }
  0xa4   : > { %v262_v9 = vsub.f32 %v259_v7, %v261_v8 }
  0xa6   : > { %v263_v10 = vmul.f32 1.442695, %v262_v9 }
  0xa8   : > { %911 = vpow2.f32 %v263_v10 }
  0xb2   : > { %v912_v11 = vpop.eup %911 }
  0xb3   : > { %265 = vadd.xlane.f32.xlu0 %v912_v11 }
 0x140   : > { %v266_v12 = vpop.xlane.xlu0 %265 }
 0x141   : > { %913 = vrcp.f32 %v266_v12 }
 0x14b   : > { %v914_v13 = vpop.eup %913 }
 0x14c   : > { %v268_v14 = vmul.f32 %v914_v13, %v912_v11 }
 0x14e   : > { %270 = vxpose.xlu1.b32.start.end [1/1] (short) %v268_v14, 128  ;;  %v496_v16 = vrot.slane %v268_v14, 4 }
 0x150   : > { %v497_v17 = vadd.f32 %v496_v16, %v268_v14 }
 0x152   : > { %v498_v18 = vrot.slane %v497_v17, 2 }
 0x154   : > { %v499_v19 = vadd.f32 %v498_v18, %v497_v17 }
 0x156   : > { %v500_v20 = vrot.slane %v499_v19, 1 }
 0x158   : > { %v501_v21 = vadd.f32 %v500_v20, %v499_v19 }
 0x15a   : > { %v518_v23 = vmul.f32 %v502_v22, %v501_v21  ;;  %v519_v25 = vmul.f32 %v503_v24, %v501_v21  ;;  %v520_v27 = vmul.f32 %v504_v26, %v501_v21  ;;  %v521_v29 = vmul.f32 %v505_v28, %v501_v21 }
 0x15b   : > { %v522_v31 = vmul.f32 %v506_v30, %v501_v21  ;;  %v523_v33 = vmul.f32 %v507_v32, %v501_v21  ;;  %v524_v35 = vmul.f32 %v508_v34, %v501_v21  ;;  %v525_v37 = vmul.f32 %v509_v36, %v501_v21 }
 0x15c   : > { %v526_v39 = vmul.f32 %v510_v38, %v501_v21  ;;  %v527_v41 = vmul.f32 %v511_v40, %v501_v21  ;;  %v528_v43 = vmul.f32 %v512_v42, %v501_v21  ;;  %v529_v45 = vmul.f32 %v513_v44, %v501_v21 }
 0x15d   : > { %v530_v47 = vmul.f32 %v514_v46, %v501_v21  ;;  %v531_v49 = vmul.f32 %v515_v48, %v501_v21  ;;  %v532_v51 = vmul.f32 %v516_v50, %v501_v21  ;;  %v533_v53 = vmul.f32 %v517_v52, %v501_v21 }
 0x18b   : > { %534 = vxpose.xlu1.b32.start [1/16] %v518_v23, 128 }
 0x18f   : > { %535 = vxpose.xlu1.b32.cont [2/16] %v519_v25, 128 }
 0x193   : > { %536 = vxpose.xlu1.b32.cont [3/16] %v520_v27, 128 }
 0x197   : > { %537 = vxpose.xlu1.b32.cont [4/16] %v521_v29, 128 }
 0x19b   : > { %538 = vxpose.xlu1.b32.cont [5/16] %v522_v31, 128 }
 0x19f   : > { %539 = vxpose.xlu1.b32.cont [6/16] %v523_v33, 128 }
 0x1a3   : > { %540 = vxpose.xlu1.b32.cont [7/16] %v524_v35, 128 }
 0x1a7   : > { %541 = vxpose.xlu1.b32.cont [8/16] %v525_v37, 128 }
 0x1ab   : > { %542 = vxpose.xlu1.b32.cont [9/16] %v526_v39, 128 }
 0x1af   : > { %543 = vxpose.xlu1.b32.cont [10/16] %v527_v41, 128 }
 0x1b3   : > { %544 = vxpose.xlu1.b32.cont [11/16] %v528_v43, 128 }
 0x1b7   : > { %545 = vxpose.xlu1.b32.cont [12/16] %v529_v45, 128 }
 0x1bb   : > { %546 = vxpose.xlu1.b32.cont [13/16] %v530_v47, 128 }
 0x1bf   : > { %547 = vxpose.xlu1.b32.cont [14/16] %v531_v49, 128 }
 0x1c3   : > { %548 = vxpose.xlu1.b32.cont [15/16] %v532_v51, 128 }
 0x1c7   : > { %549 = vxpose.xlu1.b32.end [16/16] %v533_v53, 128 }
 0x1ce   : > { %v286_v54 = vpop.trf.xlu1 }
 0x1cf   : > { %871 = vmatprep.mubr.msk.f32.mxu0 %vm302_vm1, %v286_v54 }
 0x1d2   : > { %v287_v55 = vpop.trf.xlu1 }
 0x1d3   : > { %872 = vmatmul.mubr.msk.f32.vlgmr.msra.gmra.mrb[0].mxu0 %vm302_vm1, %v287_v55 }
 0x1d6   : > { %v288_v56 = vpop.trf.xlu1 }
 0x1d7   : > { %874 = vmatprep.mubr.msk.f32.mxu0 %vm302_vm1, %v288_v56 }
 0x1da   : > { %v289_v57 = vpop.trf.xlu1 }
 0x1db   : > { %875 = vmatmul.mubr.msk.f32.gmra.mrb[2].mxu0 %vm302_vm1, %v289_v57 }
 0x1de   : > { %v290_v58 = vpop.trf.xlu1 }
 0x1df   : > { %877 = vmatprep.mubr.msk.f32.mxu0 %vm302_vm1, %v290_v58 }
 0x1e2   : > { %v291_v59 = vpop.trf.xlu1 }
 0x1e3   : > { %878 = vmatmul.mubr.msk.f32.gmra.mrb[4].mxu0 %vm302_vm1, %v291_v59 }
 0x1e6   : > { %v292_v60 = vpop.trf.xlu1 }
 0x1e7   : > { %880 = vmatprep.mubr.msk.f32.mxu0 %vm302_vm1, %v292_v60 }
 0x1ea   : > { %v293_v61 = vpop.trf.xlu1 }
 0x1eb   : > { %881 = vmatmul.mubr.msk.f32.gmra.mrb[6].mxu0 %vm302_vm1, %v293_v61 }
 0x1ee   : > { %v294_v62 = vpop.trf.xlu1 }
 0x1ef   : > { %883 = vmatprep.mubr.msk.f32.mxu1 %vm302_vm1, %v294_v62 }
 0x1f2   : > { %v295_v63 = vpop.trf.xlu1 }
 0x1f3   : > { %884 = vmatmul.mubr.msk.f32.vlgmr.msra.gmra.mrb[0].mxu1 %vm302_vm1, %v295_v63 }
 0x1f6   : > { %v296_v0 = vpop.trf.xlu1 }
 0x1f7   : > { %886 = vmatprep.mubr.msk.f32.mxu1 %vm302_vm1, %v296_v0 }
 0x1fa   : > { %v297_v1 = vpop.trf.xlu1 }
 0x1fb   : > { %887 = vmatmul.mubr.msk.f32.gmra.mrb[2].mxu1 %vm302_vm1, %v297_v1 }
 0x1fe   : > { %v298_v2 = vpop.trf.xlu1 }
 0x1ff   : > { %889 = vmatprep.mubr.msk.f32.mxu1 %vm302_vm1, %v298_v2 }
 0x202   : > { %v299_v3 = vpop.trf.xlu1 }
 0x203   : > { %890 = vmatmul.mubr.msk.f32.gmra.mrb[4].mxu1 %vm302_vm1, %v299_v3 }
 0x206   : > { %v300_v4 = vpop.trf.xlu1 }
 0x207   : > { %892 = vmatprep.mubr.msk.f32.mxu1 %vm302_vm1, %v300_v4 }
 0x20a   : > { %v301_v5 = vpop.trf.xlu1 }
 0x20b   : > { %893 = vmatmul.mubr.msk.f32.gmra.mrb[6].mxu1 %vm302_vm1, %v301_v5 }
 0x20e   : > { %v550_v6 = vpop.trf.xlu1 }
 0x212   : > { %v551_v7 = vpop.trf.xlu1 }
 0x216   : > { %v552_v8 = vpop.trf.xlu1 }
 0x21a   : > { %v553_v9 = vpop.trf.xlu1 }
 0x21e   : > { %v554_v10 = vpop.trf.xlu1 }
 0x222   : > { %v555_v11 = vpop.trf.xlu1 }
 0x226   : > { %v556_v17 = vpop.trf.xlu1 }
 0x22a   : > { %v557_v22 = vpop.trf.xlu1 }
 0x22e   : > { %v558_v26 = vpop.trf.xlu1 }
 0x232   : > { %v559_v32 = vpop.trf.xlu1 }
 0x236   : > { %v560_v39 = vpop.trf.xlu1 }
 0x23a   : > { %v561_v44 = vpop.trf.xlu1 }
 0x23e   : > { %v562_v48 = vpop.trf.xlu1 }
 0x242   : > { %v563_v54 = vpop.trf.xlu1 }
 0x246   : > { %v564_v60 = vpop.trf.xlu1 }
 0x24a   : > { %v565_v0 = vpop.trf.xlu1 }
 0x2a6   : > { %v873_v12 = vpop.f32.mrb[0].mxu0 }
 0x2a7   : > { %v1075_v13 = vsub.f32 %v873_v12, %v551_v7  ;;  %v417_v14 = vpop.f32.mrb[1].mxu0 }
 0x2a8   : > { %v1077_v15 = vsub.f32 %v417_v14, %v550_v6 }
 0x2a9   : > { %v583_v16 = vmul.f32 %v1075_v13, %v1075_v13 }
 0x2aa   : > { %v582_v18 = vmul.f32 %v1077_v15, %v1077_v15 }
 0x2ab   : > { %600 = vadd.xlane.f32.xlu0 %v583_v16 }
 0x2ae   : > { %v876_v19 = vpop.f32.mrb[2].mxu0 }
 0x2af   : > { %v1083_v20 = vsub.f32 %v876_v19, %v553_v9  ;;  %v427_v21 = vpop.f32.mrb[3].mxu0  ;;  %598 = vadd.xlane.f32.xlu0 %v582_v18 }
 0x2b0   : > { %v1085_v23 = vsub.f32 %v427_v21, %v552_v8 }
 0x2b1   : > { %v585_v24 = vmul.f32 %v1083_v20, %v1083_v20 }
 0x2b2   : > { %v584_v25 = vmul.f32 %v1085_v23, %v1085_v23 }
 0x2b3   : > { %604 = vadd.xlane.f32.xlu0 %v585_v24 }
 0x2b6   : > { %v879_v27 = vpop.f32.mrb[4].mxu0 }
 0x2b7   : > { %v1091_v28 = vsub.f32 %v879_v27, %v555_v11  ;;  %v437_v29 = vpop.f32.mrb[5].mxu0  ;;  %602 = vadd.xlane.f32.xlu0 %v584_v25 }
 0x2b8   : > { %v1093_v30 = vsub.f32 %v437_v29, %v554_v10 }
 0x2b9   : > { %v587_v31 = vmul.f32 %v1091_v28, %v1091_v28 }
 0x2ba   : > { %v586_v33 = vmul.f32 %v1093_v30, %v1093_v30 }
 0x2bb   : > { %608 = vadd.xlane.f32.xlu0 %v587_v31 }
 0x2be   : > { %v882_v34 = vpop.f32.mrb[6].mxu0 }
 0x2bf   : > { %v1099_v35 = vsub.f32 %v882_v34, %v557_v22  ;;  %v447_v36 = vpop.f32.mrb[7].mxu0  ;;  %606 = vadd.xlane.f32.xlu0 %v586_v33 }
 0x2c0   : > { %v1101_v37 = vsub.f32 %v447_v36, %v556_v17 }
 0x2c1   : > { %v589_v38 = vmul.f32 %v1099_v35, %v1099_v35 }
 0x2c2   : > { %v588_v40 = vmul.f32 %v1101_v37, %v1101_v37 }
 0x2c3   : > { %612 = vadd.xlane.f32.xlu0 %v589_v38 }
 0x2c6   : > { %v885_v41 = vpop.f32.mrb[0].mxu1 }
 0x2c7   : > { %v1107_v42 = vsub.f32 %v885_v41, %v559_v32  ;;  %v457_v43 = vpop.f32.mrb[1].mxu1  ;;  %610 = vadd.xlane.f32.xlu0 %v588_v40 }
 0x2c8   : > { %v1109_v45 = vsub.f32 %v457_v43, %v558_v26 }
 0x2c9   : > { %v591_v46 = vmul.f32 %v1107_v42, %v1107_v42 }
 0x2ca   : > { %v590_v47 = vmul.f32 %v1109_v45, %v1109_v45 }
 0x2cb   : > { %616 = vadd.xlane.f32.xlu0 %v591_v46 }
 0x2ce   : > { %v888_v49 = vpop.f32.mrb[2].mxu1 }
 0x2cf   : > { %v1115_v50 = vsub.f32 %v888_v49, %v561_v44  ;;  %v467_v51 = vpop.f32.mrb[3].mxu1  ;;  %614 = vadd.xlane.f32.xlu0 %v590_v47 }
 0x2d0   : > { %v1117_v52 = vsub.f32 %v467_v51, %v560_v39 }
 0x2d1   : > { %v593_v53 = vmul.f32 %v1115_v50, %v1115_v50 }
 0x2d2   : > { %v592_v55 = vmul.f32 %v1117_v52, %v1117_v52 }
 0x2d3   : > { %620 = vadd.xlane.f32.xlu0 %v593_v53 }
 0x2d6   : > { %v891_v56 = vpop.f32.mrb[4].mxu1 }
 0x2d7   : > { %v1123_v57 = vsub.f32 %v891_v56, %v563_v54  ;;  %v477_v58 = vpop.f32.mrb[5].mxu1  ;;  %618 = vadd.xlane.f32.xlu0 %v592_v55 }
 0x2d8   : > { %v1125_v59 = vsub.f32 %v477_v58, %v562_v48 }
 0x2d9   : > { %v595_v61 = vmul.f32 %v1123_v57, %v1123_v57 }
 0x2da   : > { %v594_v62 = vmul.f32 %v1125_v59, %v1125_v59 }
 0x2db   : > { %624 = vadd.xlane.f32.xlu0 %v595_v61 }
 0x2de   : > { %v894_v63 = vpop.f32.mrb[6].mxu1 }
 0x2df   : > { %v487_v1 = vpop.f32.mrb[7].mxu1  ;;  %622 = vadd.xlane.f32.xlu0 %v594_v62  ;;  %v1133_v3 = vsub.f32 %v894_v63, %v565_v0 }
 0x2e0   : > { %v1131_v2 = vsub.f32 %v487_v1, %v564_v60 }
 0x2e1   : > { %v597_v5 = vmul.f32 %v1133_v3, %v1133_v3 }
 0x2e2   : > { %v596_v4 = vmul.f32 %v1131_v2, %v1131_v2 }
 0x2e4   : > { %626 = vadd.xlane.f32.xlu0 %v596_v4 }
 0x2e8   : > { %628 = vadd.xlane.f32.xlu0 %v597_v5 }
 0x338   : > { %v601_v6 = vpop.xlane.xlu0 %600 }
 0x339   : > { %v631_v11 = vmax.f32 %v601_v6, 1e-24 }
 0x33c   : > { %v599_v7 = vpop.xlane.xlu0 %598 }
 0x33d   : > { %v630_v10 = vmax.f32 %v599_v7, 1e-24 }
 0x33f   : > { %915 = vrsqrt.f32 %v630_v10 }
 0x340   : > { %v605_v8 = vpop.xlane.xlu0 %604  ;;  %917 = vrsqrt.f32 %v631_v11 }
 0x341   : > { %v633_v16 = vmax.f32 %v605_v8, 1e-24 }
 0x344   : > { %v603_v9 = vpop.xlane.xlu0 %602 }
 0x345   : > { %v632_v12 = vmax.f32 %v603_v9, 1e-24 }
 0x347   : > { %919 = vrsqrt.f32 %v632_v12 }
 0x348   : > { %v609_v14 = vpop.xlane.xlu0 %608  ;;  %921 = vrsqrt.f32 %v633_v16 }
 0x349   : > { %v635_v21 = vmax.f32 %v609_v14, 1e-24  ;;  %v916_v22 = vpop.eup %915 }
 0x34a   : > { %v918_v24 = vpop.eup %917  ;;  %v1140_v29 = vmul.f32 %v916_v22, %v1077_v15 }
 0x34b   : > { %v1143_v31 = vmul.f32 %v918_v24, %v1075_v13 }
 0x34c   : > { %v607_v17 = vpop.xlane.xlu0 %606  ;;  %v678_v38 = vmul.f32 %v1140_v29, %v1140_v29 }
 0x34d   : > { %v634_v18 = vmax.f32 %v607_v17, 1e-24  ;;  %v679_v40 = vmul.f32 %v1143_v31, %v1143_v31 }
 0x34f   : > { %923 = vrsqrt.f32 %v634_v18  ;;  %v694_v43 = vadd.f32 %v679_v40, %v678_v38 }
 0x350   : > { %v613_v19 = vpop.xlane.xlu0 %612  ;;  %925 = vrsqrt.f32 %v635_v21 }
 0x351   : > { %v920_v26 = vpop.eup %919  ;;  %v637_v34 = vmax.f32 %v613_v19, 1e-24 }
 0x352   : > { %v1146_v32 = vmul.f32 %v920_v26, %v1085_v23  ;;  %v922_v36 = vpop.eup %921 }
 0x353   : > { %v1155_v23 = vmul.f32 %v922_v36, %v1083_v20 }
 0x354   : > { %v611_v25 = vpop.xlane.xlu0 %610  ;;  %v680_v15 = vmul.f32 %v1146_v32, %v1146_v32 }
 0x355   : > { %v636_v27 = vmax.f32 %v611_v25, 1e-24  ;;  %v681_v53 = vmul.f32 %v1155_v23, %v1155_v23 }
 0x356   : > { %v695_v48 = vadd.f32 %v694_v43, %v680_v15 }
 0x357   : > { %927 = vrsqrt.f32 %v636_v27 }
 0x358   : > { %v617_v33 = vpop.xlane.xlu0 %616  ;;  %929 = vrsqrt.f32 %v637_v34  ;;  %v696_v20 = vadd.f32 %v695_v48, %v681_v53 }
 0x359   : > { %v924_v39 = vpop.eup %923  ;;  %v639_v46 = vmax.f32 %v617_v33, 1e-24 }
 0x35a   : > { %v1158_v44 = vmul.f32 %v924_v39, %v1093_v30  ;;  %v926_v47 = vpop.eup %925 }
 0x35b   : > { %v1165_v55 = vmul.f32 %v926_v47, %v1091_v28 }
 0x35c   : > { %v615_v41 = vpop.xlane.xlu0 %614  ;;  %v682_v54 = vmul.f32 %v1158_v44, %v1158_v44 }
 0x35d   : > { %v638_v13 = vmax.f32 %v615_v41, 1e-24  ;;  %v683_v63 = vmul.f32 %v1165_v55, %v1165_v55 }
 0x35e   : > { %v697_v61 = vadd.f32 %v696_v20, %v682_v54 }
 0x35f   : > { %931 = vrsqrt.f32 %v638_v13 }
 0x360   : > { %v621_v49 = vpop.xlane.xlu0 %620  ;;  %933 = vrsqrt.f32 %v639_v46 }
 0x361   : > { %v928_v51 = vpop.eup %927  ;;  %v641_v58 = vmax.f32 %v621_v49, 1e-24 }
 0x362   : > { %v1168_v30 = vmul.f32 %v928_v51, %v1101_v37  ;;  %v930_v62 = vpop.eup %929  ;;  %v698_v37 = vadd.f32 %v697_v61, %v683_v63 }
 0x363   : > { %v1175_v28 = vmul.f32 %v930_v62, %v1099_v35 }
 0x364   : > { %v619_v56 = vpop.xlane.xlu0 %618  ;;  %v684_v0 = vmul.f32 %v1168_v30, %v1168_v30 }
 0x365   : > { %v640_v60 = vmax.f32 %v619_v56, 1e-24  ;;  %v685_v11 = vmul.f32 %v1175_v28, %v1175_v28 }
 0x366   : > { %v699_v7 = vadd.f32 %v698_v37, %v684_v0 }
 0x367   : > { %935 = vrsqrt.f32 %v640_v60 }
 0x368   : > { %v625_v1 = vpop.xlane.xlu0 %624  ;;  %937 = vrsqrt.f32 %v641_v58  ;;  %v700_v14 = vadd.f32 %v699_v7, %v685_v11 }
 0x369   : > { %v932_v4 = vpop.eup %931  ;;  %v643_v6 = vmax.f32 %v625_v1, 1e-24 }
 0x36a   : > { %v1178_v5 = vmul.f32 %v932_v4, %v1109_v45  ;;  %v934_v9 = vpop.eup %933 }
 0x36b   : > { %939 = vrsqrt.f32 %v643_v6  ;;  %v1185_v35 = vmul.f32 %v934_v9, %v1107_v42 }
 0x36c   : > { %v623_v8 = vpop.xlane.xlu0 %622  ;;  %v686_v12 = vmul.f32 %v1178_v5, %v1178_v5 }
 0x36d   : > { %v642_v10 = vmax.f32 %v623_v8, 1e-24  ;;  %v687_v22 = vmul.f32 %v1185_v35, %v1185_v35 }
 0x36e   : > { %v701_v19 = vadd.f32 %v700_v14, %v686_v12 }
 0x36f   : > { %941 = vrsqrt.f32 %v642_v10 }
 0x370   : > { %v702_v33 = vadd.f32 %v701_v19, %v687_v22 }
 0x371   : > { %v936_v16 = vpop.eup %935  ;;  %v627_v45 = vpop.xlane.xlu0 %626 }
 0x372   : > { %v672_v17 = vmul.f32 %v936_v16, %v1117_v52  ;;  %v644_v18 = vmax.f32 %v627_v45, 1e-24  ;;  %v938_v21 = vpop.eup %937 }
 0x373   : > { %v673_v26 = vmul.f32 %v938_v21, %v1115_v50 }
 0x374   : > { %943 = vrsqrt.f32 %v644_v18  ;;  %v688_v24 = vmul.f32 %v672_v17, %v672_v17 }
 0x375   : > { %v629_v25 = vpop.xlane.xlu0 %628  ;;  %v940_v42 = vpop.eup %939  ;;  %v689_v52 = vmul.f32 %v673_v26, %v673_v26 }
 0x376   : > { %v645_v27 = vmax.f32 %v629_v25, 1e-24  ;;  %v703_v34 = vadd.f32 %v702_v33, %v688_v24  ;;  %v675_v39 = vmul.f32 %v940_v42, %v1123_v57 }
 0x378   : > { %945 = vrsqrt.f32 %v645_v27  ;;  %v704_v15 = vadd.f32 %v703_v34, %v689_v52  ;;  %v691_v46 = vmul.f32 %v675_v39, %v675_v39 }
 0x379   : > { %v942_v36 = vpop.eup %941 }
 0x37a   : > { %v674_v38 = vmul.f32 %v942_v36, %v1125_v59 }
 0x37c   : > { %v690_v40 = vmul.f32 %v674_v38, %v674_v38 }
 0x37e   : > { %v944_v41 = vpop.eup %943  ;;  %v705_v13 = vadd.f32 %v704_v15, %v690_v40 }
 0x37f   : > { %v676_v43 = vmul.f32 %v944_v41, %v1131_v2 }
 0x380   : > { %v706_v50 = vadd.f32 %v705_v13, %v691_v46 }
 0x381   : > { %v692_v47 = vmul.f32 %v676_v43, %v676_v43 }
 0x382   : > { %v946_v48 = vpop.eup %945 }
 0x383   : > { %v677_v49 = vmul.f32 %v946_v48, %v1133_v3  ;;  %v707_v53 = vadd.f32 %v706_v50, %v692_v47 }
 0x385   : > { %v693_v51 = vmul.f32 %v677_v49, %v677_v49 }
 0x387   : > { %v708_v54 = vadd.f32 %v707_v53, %v693_v51 }
 0x389   : > { %709 = vadd.xlane.f32.xlu0 %v708_v54 }
 0x416   : > { %v710_v59 = vpop.xlane.xlu0 %709 }
 0x417   : > { %v711_v20 = vrot.slane %v710_v59, 4 }
 0x419   : > { %v712_v57 = vadd.f32 %v711_v20, %v710_v59 }
 0x41b   : > { %v713_v56 = vrot.slane %v712_v57, 2 }
 0x41d   : > { %v714_v58 = vadd.f32 %v713_v56, %v712_v57 }
 0x41f   : > { %v715_v60 = vrot.slane %v714_v58, 1 }
 0x421   : > { %v716_v61 = vadd.f32 %v715_v60, %v714_v58 }
 0x423   : > { %897 = vpush %v716_v61 }
 0x454   : > { %s898_s15 = spop %897 }
 0x455   : > { %s718_s17 = smax.f32 %s957_s16, %s898_s15 }
 0x456   : > { %v719_v2 = vstv %s718_s17 }
 0x457   : > { %947 = vrsqrt.f32 %v719_v2 }
 0x461   : > { %v948_v62 = vpop.eup %947 }
 0x462   : > { %899 = vpush %v948_v62 }
 0x493   : > { %s900_s21 = spop %899 }
 0x494   : > { %v722_v3 = vstv %s900_s21 }
 0x495   : > { %v723_v63 = vmul.f32 %v722_v3, %v1140_v29  ;;  %v724_v0 = vmul.f32 %v722_v3, %v1143_v31  ;;  %v725_v1 = vmul.f32 %v722_v3, %v1146_v32  ;;  %v726_v4 = vmul.f32 %v722_v3, %v1155_v23 }
 0x496   : > { %v727_v37 = vmul.f32 %v722_v3, %v1158_v44  ;;  %v728_v6 = vmul.f32 %v722_v3, %v1165_v55  ;;  %v729_v7 = vmul.f32 %v722_v3, %v1168_v30  ;;  %v730_v8 = vmul.f32 %v722_v3, %v1175_v28 }
 0x497   : > { %v731_v29 = vmul.f32 %v722_v3, %v1178_v5  ;;  %v732_v31 = vmul.f32 %v722_v3, %v1185_v35  ;;  %v733_v32 = vmul.f32 %v722_v3, %v672_v17  ;;  %v734_v23 = vmul.f32 %v722_v3, %v673_v26  ;;  %739 = vst [vmem:[%s1199_s24] sm:$0xff] %v723_v63 }
 0x498   : > { %740 = vst [vmem:[%s1199_s24 + $0x8] sm:$0xff] %v724_v0  ;;  %741 = vst [vmem:[%s1199_s24 + $0x10] sm:$0xff] %v725_v1  ;;  %v735_v44 = vmul.f32 %v722_v3, %v674_v38  ;;  %v736_v55 = vmul.f32 %v722_v3, %v675_v39  ;;  %v737_v30 = vmul.f32 %v722_v3, %v676_v43 }
 0x499   : > { %742 = vst [vmem:[%s1199_s24 + $0x18] sm:$0xff] %v726_v4  ;;  %v738_v28 = vmul.f32 %v722_v3, %v677_v49  ;;  %743 = vst [vmem:[%s1199_s24 + $0x20] sm:$0xff] %v727_v37 }
 0x49a   : > { %744 = vst [vmem:[%s1199_s24 + $0x28] sm:$0xff] %v728_v6  ;;  %745 = vst [vmem:[%s1199_s24 + $0x30] sm:$0xff] %v729_v7 }
 0x49b   : > { %746 = vst [vmem:[%s1199_s24 + $0x38] sm:$0xff] %v730_v8  ;;  %747 = vst [vmem:[%s1199_s24 + $0x40] sm:$0xff] %v731_v29 }
 0x49c   : > { %748 = vst [vmem:[%s1199_s24 + $0x48] sm:$0xff] %v732_v31  ;;  %749 = vst [vmem:[%s1199_s24 + $0x50] sm:$0xff] %v733_v32 }
 0x49d   : > { %750 = vst [vmem:[%s1199_s24 + $0x58] sm:$0xff] %v734_v23  ;;  %751 = vst [vmem:[%s1199_s24 + $0x60] sm:$0xff] %v735_v44 }
 0x49e   : > { %752 = vst [vmem:[%s1199_s24 + $0x68] sm:$0xff] %v736_v55  ;;  %753 = vst [vmem:[%s1199_s24 + $0x70] sm:$0xff] %v737_v30 }
 0x49f   : > { %754 = vst [vmem:[%s1199_s24 + $0x78] sm:$0xff] %v738_v28 }
 0x4a0 PF: > { %s15_s18 = sadd.s32 1, %s955_s18  }
 0x4a1   : > { %p12_p4 = scmp.ge.s32.totalorder %s15_s18, 4  }
 0x4a3   :  { %14 = sbr.rel (!%p12_p4) target bundleno = 1 (0x1), region = 73 }

</bundles_post_ra>
